<compile_context>
chip_gen: v7x
topology: tpu7x:2x2x1
jax: 0.10.0
libtpu: 0.0.40
codegen_flags: <defaults>
</compile_context>

<pallas_src>
import functools

import jax
import jax.numpy as jnp
from jax.experimental import pallas as pl
from jax.experimental.pallas import tpu as pltpu

LANE = 128            # TPU lane width: only the OUTPUT feature dim is padded to this
MIN_TILE_B = 256      # smallest batch tile we will use (multiple of 8 sublanes / 128 MXU rows)
DEFAULT_TILE_B = 1024 # batch tile upper bound (mem-bound kernels hit ~85% roofline by 512-1024)


def _round_up(n, m):
    return ((n + m - 1) // m) * m


def _pick_tile_b(batch, tile_b):
    """Cap the tile so large batches still give >=2 grid tiles (v7x has 2 TensorCores)."""
    half = _round_up(max(batch, 1), 2 * MIN_TILE_B) // 2   # multiple of MIN_TILE_B
    return max(MIN_TILE_B, min(tile_b, half))


def qnet_kernel(x_ref, w1_ref, b1_ref, w2_ref, b2_ref, w3_ref, b3_ref, out_ref):
    """Fused 3-layer MLP on one batch tile.

    x and all weights/biases are f32; matmuls accumulate in f32 (MXU slack makes the
    all-f32 path free in this HBM-bound regime).  Weights & biases stay VMEM-resident
    across the batch grid (constant index_maps); only x / out tiles stream from HBM.
    The only precision loss is the final bf16 store.
    """
    x = x_ref[...]                                                          # (TILE_B, 16) f32
    h1 = jnp.maximum(
        jnp.dot(x, w1_ref[...], preferred_element_type=jnp.float32) + b1_ref[...], 0.0)
    h2 = jnp.maximum(
        jnp.dot(h1, w2_ref[...], preferred_element_type=jnp.float32) + b2_ref[...], 0.0)
    out = jnp.dot(h2, w3_ref[...], preferred_element_type=jnp.float32) + b3_ref[...]
    out_ref[...] = out.astype(out_ref.dtype)                                # (TILE_B, 128) bf16


def prepare_params(params):
    """Keep w1/w2 at natural width; zero-pad only the last layer's output dim to 128 lanes.

    Zero padding is exact: padded output columns get zero weight columns and zero bias,
    so they produce zeros that the wrapper slices off.
    """
    def pad_last(w):
        i, o = w.shape
        wp = jnp.zeros((i, _round_up(o, LANE)), jnp.float32)
        return wp.at[:, :o].set(w)

    def pad_b(b):
        o = b.shape[-1]
        bp = jnp.zeros((1, _round_up(o, LANE)), jnp.float32)
        return bp.at[:, :o].set(b.reshape(1, -1))

    return {
        "w1": params["w1"].astype(jnp.float32), "b1": params["b1"].reshape(1, -1).astype(jnp.float32),
        "w2": params["w2"].astype(jnp.float32), "b2": params["b2"].reshape(1, -1).astype(jnp.float32),
        "w3": pad_last(params["w3"]),           "b3": pad_b(params["b3"]),
    }


@functools.partial(jax.jit, static_argnames=("action_size", "tile_b"))
def qnetwork_forward(x, pparams, *, action_size, tile_b=DEFAULT_TILE_B):
    """x: [B, state_size] f32. pparams: output of prepare_params(). Returns [B, action_size] f32."""
    B, S = x.shape
    w1, b1 = pparams["w1"], pparams["b1"]
    w2, b2 = pparams["w2"], pparams["b2"]
    w3, b3 = pparams["w3"], pparams["b3"]
    A_pad = w3.shape[1]

    eff_tile = _pick_tile_b(B, tile_b)
    B_pad = _round_up(max(B, 1), eff_tile)
    # Batch-pad only (no feature padding, no dtype cast): cheap, and a no-op when B % tile == 0.
    xp = x if B_pad == B else jnp.pad(x, ((0, B_pad - B), (0, 0)))

    grid = (B_pad // eff_tile,)
    resident = lambda shape: pl.BlockSpec(shape, lambda i: (0, 0))  # stays in VMEM, no re-DMA

    out = pl.pallas_call(
        qnet_kernel,
        out_shape=jax.ShapeDtypeStruct((B_pad, A_pad), jnp.bfloat16),  # bf16: half the writeback
        grid=grid,
        in_specs=[
            pl.BlockSpec((eff_tile, S), lambda i: (i, 0)),   # streamed batch tile, natural width
            resident(w1.shape), resident(b1.shape),
            resident(w2.shape), resident(b2.shape),
            resident(w3.shape), resident(b3.shape),
        ],
        out_specs=pl.BlockSpec((eff_tile, A_pad), lambda i: (i, 0)),  # lane-dense 128-wide stores
        compiler_params=pltpu.CompilerParams(
            dimension_semantics=("parallel",),   # shard batch grid across v7x's 2 TCs
        ),
    )(xp, w1, b1, w2, b2, w3, b3)

    # Small slice; cast back to f32 for parity with the PyTorch module's output dtype.
    return out[:B, :action_size].astype(jnp.float32)


def init_params(key, state_size, action_size, hidden=64):
    """Deterministic synthetic init (uniform, PyTorch nn.Linear default scale)."""
    ks = jax.random.split(key, 6)

    def lin(kw, kb, fan_in, fan_out):
        bound = 1.0 / jnp.sqrt(fan_in)
        # stored as [in, out] (i.e. W.T relative to PyTorch's [out, in])
        w = jax.random.uniform(kw, (fan_in, fan_out), jnp.float32, -bound, bound)
        b = jax.random.uniform(kb, (1, fan_out), jnp.float32, -bound, bound)
        return w, b

    w1, b1 = lin(ks[0], ks[1], state_size, hidden)
    w2, b2 = lin(ks[2], ks[3], hidden, hidden)
    w3, b3 = lin(ks[4], ks[5], hidden, action_size)
    return {"w1": w1, "b1": b1, "w2": w2, "b2": b2, "w3": w3, "b3": b3}


def qnetwork_ref(x, p):
    """Pure-JAX f32 reference (PyTorch-equivalent forward)."""
    h1 = jnp.maximum(x @ p["w1"] + p["b1"], 0.0)
    h2 = jnp.maximum(h1 @ p["w2"] + p["b2"], 0.0)
    return h2 @ p["w3"] + p["b3"]


if __name__ == "__main__":
    key = jax.random.PRNGKey(0)
    k_x, k_p = jax.random.split(key)

    # Small, module-consistent shapes: SUMO observation vector -> Q-values per action.
    # (For real DQN use, batch the whole replay minibatch / all vector-env states per call.)
    batch, state_size, action_size = 8, 16, 4

    x = jax.random.normal(k_x, (batch, state_size), jnp.float32)
    params = init_params(k_p, state_size, action_size)
    pparams = prepare_params(params)

    out = qnetwork_forward(x, pparams, action_size=action_size)
    out = jax.block_until_ready(out)

    ref = qnetwork_ref(x, params)
    assert out.shape == (batch, action_size)
    # f32 compute throughout; only the final store rounds to bf16 -> tight-ish tolerance.
    assert jnp.allclose(out, ref, atol=3e-2, rtol=1e-2), (
        f"max abs err {jnp.max(jnp.abs(out - ref))}"
    )

    print("KERNEL_OK")
</pallas_src>

<mosaic_0001>
module attributes {stable_mosaic.version = 11 : i64} {
  func.func @qnet_kernel(%arg0: i32, %arg1: memref<256x16xf32, #tpu.memory_space<vmem>>, %arg2: memref<16x64xf32, #tpu.memory_space<vmem>>, %arg3: memref<1x64xf32, #tpu.memory_space<vmem>>, %arg4: memref<64x64xf32, #tpu.memory_space<vmem>>, %arg5: memref<1x64xf32, #tpu.memory_space<vmem>>, %arg6: memref<64x128xf32, #tpu.memory_space<vmem>>, %arg7: memref<1x128xf32, #tpu.memory_space<vmem>>, %arg8: memref<256x128xbf16, #tpu.memory_space<vmem>>) attributes {dimension_semantics = [#tpu.dimension_semantics<parallel>], iteration_bounds = array<i64: 1>, scalar_prefetch = 0 : i64, scratch_operands = 0 : i64, tpu.core_type = #tpu.core_type<tc>, window_params = [{transform_indices = @transform_0, window_bounds = array<i64: 256, 16>}, {pipeline_mode = #tpu.pipeline_mode<synchronous>, transform_indices = @transform_1, window_bounds = array<i64: 16, 64>}, {pipeline_mode = #tpu.pipeline_mode<synchronous>, transform_indices = @transform_2, window_bounds = array<i64: 1, 64>}, {pipeline_mode = #tpu.pipeline_mode<synchronous>, transform_indices = @transform_3, window_bounds = array<i64: 64, 64>}, {pipeline_mode = #tpu.pipeline_mode<synchronous>, transform_indices = @transform_4, window_bounds = array<i64: 1, 64>}, {pipeline_mode = #tpu.pipeline_mode<synchronous>, transform_indices = @transform_5, window_bounds = array<i64: 64, 128>}, {pipeline_mode = #tpu.pipeline_mode<synchronous>, transform_indices = @transform_6, window_bounds = array<i64: 1, 128>}, {transform_indices = @transform_7, window_bounds = array<i64: 256, 128>}]} {
    %c0 = arith.constant 0 : index
    %c0_0 = arith.constant 0 : index
    %0 = vector.load %arg1[%c0, %c0_0] : memref<256x16xf32, #tpu.memory_space<vmem>>, vector<256x16xf32>
    %c0_1 = arith.constant 0 : index
    %c0_2 = arith.constant 0 : index
    %1 = vector.load %arg2[%c0_1, %c0_2] : memref<16x64xf32, #tpu.memory_space<vmem>>, vector<16x64xf32>
    %cst = arith.constant dense<0.000000e+00> : vector<256x64xf32>
    %2 = tpu.matmul %0, %1, %cst {dimension_numbers = #tpu.dot_dimension_numbers<[1], [0], [0], [1], [0, 0, 1, 1], [], []>} : vector<256x16xf32>, vector<16x64xf32>, vector<256x64xf32> -> vector<256x64xf32>
    %c0_3 = arith.constant 0 : index
    %c0_4 = arith.constant 0 : index
    %3 = vector.load %arg3[%c0_3, %c0_4] : memref<1x64xf32, #tpu.memory_space<vmem>>, vector<1x64xf32>
    %4 = vector.broadcast %3 : vector<1x64xf32> to vector<256x64xf32>
    %5 = arith.addf %2, %4 : vector<256x64xf32>
    %cst_5 = arith.constant 0.000000e+00 : f32
    %6 = vector.broadcast %cst_5 : f32 to vector<256x64xf32>
    %7 = arith.maximumf %5, %6 : vector<256x64xf32>
    %c0_6 = arith.constant 0 : index
    %c0_7 = arith.constant 0 : index
    %8 = vector.load %arg4[%c0_6, %c0_7] : memref<64x64xf32, #tpu.memory_space<vmem>>, vector<64x64xf32>
    %cst_8 = arith.constant dense<0.000000e+00> : vector<256x64xf32>
    %9 = tpu.matmul %7, %8, %cst_8 {dimension_numbers = #tpu.dot_dimension_numbers<[1], [0], [0], [1], [0, 0, 1, 1], [], []>} : vector<256x64xf32>, vector<64x64xf32>, vector<256x64xf32> -> vector<256x64xf32>
    %c0_9 = arith.constant 0 : index
    %c0_10 = arith.constant 0 : index
    %10 = vector.load %arg5[%c0_9, %c0_10] : memref<1x64xf32, #tpu.memory_space<vmem>>, vector<1x64xf32>
    %11 = vector.broadcast %10 : vector<1x64xf32> to vector<256x64xf32>
    %12 = arith.addf %9, %11 : vector<256x64xf32>
    %cst_11 = arith.constant 0.000000e+00 : f32
    %13 = vector.broadcast %cst_11 : f32 to vector<256x64xf32>
    %14 = arith.maximumf %12, %13 : vector<256x64xf32>
    %c0_12 = arith.constant 0 : index
    %c0_13 = arith.constant 0 : index
    %15 = vector.load %arg6[%c0_12, %c0_13] : memref<64x128xf32, #tpu.memory_space<vmem>>, vector<64x128xf32>
    %cst_14 = arith.constant dense<0.000000e+00> : vector<256x128xf32>
    %16 = tpu.matmul %14, %15, %cst_14 {dimension_numbers = #tpu.dot_dimension_numbers<[1], [0], [0], [1], [0, 0, 1, 1], [], []>} : vector<256x64xf32>, vector<64x128xf32>, vector<256x128xf32> -> vector<256x128xf32>
    %c0_15 = arith.constant 0 : index
    %c0_16 = arith.constant 0 : index
    %17 = vector.load %arg7[%c0_15, %c0_16] : memref<1x128xf32, #tpu.memory_space<vmem>>, vector<1x128xf32>
    %18 = vector.broadcast %17 : vector<1x128xf32> to vector<256x128xf32>
    %19 = arith.addf %16, %18 : vector<256x128xf32>
    %20 = arith.truncf %19 : vector<256x128xf32> to vector<256x128xbf16>
    %c0_17 = arith.constant 0 : index
    %c0_18 = arith.constant 0 : index
    %21 = vector.load %arg8[%c0_17, %c0_18] : memref<256x128xbf16, #tpu.memory_space<vmem>>, vector<256x128xbf16>
    tpu.vector_store %arg8[%c0_17, %c0_18], %20 {strides = array<i32>} : memref<256x128xbf16, #tpu.memory_space<vmem>>, vector<256x128xbf16>,
    return
  }
  func.func @transform_0(%arg0: i32) -> (i32, i32) {
    %c0_i32 = arith.constant 0 : i32
    %c0_i32_0 = arith.constant 0 : i32
    return %arg0, %c0_i32 : i32, i32
  }
  func.func @transform_1(%arg0: i32) -> (i32, i32) {
    %c0_i32 = arith.constant 0 : i32
    %c0_i32_0 = arith.constant 0 : i32
    %c0_i32_1 = arith.constant 0 : i32
    return %c0_i32, %c0_i32_0 : i32, i32
  }
  func.func @transform_2(%arg0: i32) -> (i32, i32) {
    %c0_i32 = arith.constant 0 : i32
    %c0_i32_0 = arith.constant 0 : i32
    %c0_i32_1 = arith.constant 0 : i32
    return %c0_i32, %c0_i32_0 : i32, i32
  }
  func.func @transform_3(%arg0: i32) -> (i32, i32) {
    %c0_i32 = arith.constant 0 : i32
    %c0_i32_0 = arith.constant 0 : i32
    %c0_i32_1 = arith.constant 0 : i32
    return %c0_i32, %c0_i32_0 : i32, i32
  }
  func.func @transform_4(%arg0: i32) -> (i32, i32) {
    %c0_i32 = arith.constant 0 : i32
    %c0_i32_0 = arith.constant 0 : i32
    %c0_i32_1 = arith.constant 0 : i32
    return %c0_i32, %c0_i32_0 : i32, i32
  }
  func.func @transform_5(%arg0: i32) -> (i32, i32) {
    %c0_i32 = arith.constant 0 : i32
    %c0_i32_0 = arith.constant 0 : i32
    %c0_i32_1 = arith.constant 0 : i32
    return %c0_i32, %c0_i32_0 : i32, i32
  }
  func.func @transform_6(%arg0: i32) -> (i32, i32) {
    %c0_i32 = arith.constant 0 : i32
    %c0_i32_0 = arith.constant 0 : i32
    %c0_i32_1 = arith.constant 0 : i32
    return %c0_i32, %c0_i32_0 : i32, i32
  }
  func.func @transform_7(%arg0: i32) -> (i32, i32) {
    %c0_i32 = arith.constant 0 : i32
    %c0_i32_0 = arith.constant 0 : i32
    return %arg0, %c0_i32 : i32, i32
  }
}

</mosaic_0001>

<bundles_post_ra>
// kernel: qnetwork_forward.1
= control target key start
LH: loop header
LB: loop body
LE: loop exit
PB: predicated region body
PF: predicated region fallthrough
CT: control target
= control target key end

     0   :  { %vm67_vm0 = vcmask 130048   ;;  %vm436_vm1 = vcmask 523264   ;;  %s2346_s1 = inlined_call_operand.vmem [shape: f32[16,64], index: 1, kind: input, shape index: {}]   ;;  %s2347_s0 = inlined_call_operand.vmem [shape: f32[256,16], index: 0, kind: input, shape index: {}]   ;;  %s2348_s3 = inlined_call_operand.vmem [shape: f32[64,64], index: 3, kind: input, shape index: {}]   ;;  %s2349_s5 = inlined_call_operand.vmem [shape: f32[64,128], index: 5, kind: input, shape index: {}]   ;;  %s2350_s2 = inlined_call_operand.vmem [shape: f32[1,64], index: 2, kind: input, shape index: {}]   ;;  %s2351_s4 = inlined_call_operand.vmem [shape: f32[1,64], index: 4, kind: input, shape index: {}]   ;;  %s2352_s6 = inlined_call_operand.vmem [shape: f32[1,128], index: 6, kind: input, shape index: {}]   ;;  %s2353_s7 = inlined_call_operand.vmem [shape: bf16[256,128], index: 7, kind: output, shape index: {}]  }
   0x1   :  { %v58_v0 = vld [vmem:[%s2346_s1] sm:$0xff]  ;;  %v59_v1 = vld [vmem:[%s2346_s1 + $0x8] sm:$0xff]  ;;  %v28_v5 = vld [vmem:[%s2347_s0 + $0x10] sm:$0xff] }
   0x2   :  { %v26_v2 = vld [vmem:[%s2347_s0] sm:$0xff]  ;;  %v1842_v3 = vpack.c.bf16 %v59_v1, %v58_v0  ;;  %v27_v4 = vld [vmem:[%s2347_s0 + $0x8] sm:$0xff]  ;;  %v44_v8 = vld [vmem:[%s2347_s0 + $0x90] sm:$0xff] }
   0x3   :  { %1666 = vmatprep.mubr.msk.f32.mxu0 %vm67_vm0, %v26_v2  ;;  %v42_v6 = vld [vmem:[%s2347_s0 + $0x80] sm:$0xff]  ;;  %v43_v7 = vld [vmem:[%s2347_s0 + $0x88] sm:$0xff]  ;;  %v29_v9 = vld [vmem:[%s2347_s0 + $0x18] sm:$0xff] }
   0x4   :  { %1843 = vmatprep.subr.bf16.mxu0 %v1842_v3  ;;  %1878 = vmatprep.subr.bf16.mxu1 %v1842_v3  ;;  %v30_v10 = vld [vmem:[%s2347_s0 + $0x20] sm:$0xff]  ;;  %v45_v11 = vld [vmem:[%s2347_s0 + $0x98] sm:$0xff]  ;;  %v422_v14 = vld [vmem:[%s2348_s3 + $0x8] sm:$0xff] }
   0x5   :  { %1845 = vmatpush3.bf16.msra.mxu0 %v1842_v3  ;;  %1879 = vmatpush3.bf16.msra.mxu1 %v1842_v3  ;;  %v46_v12 = vld [vmem:[%s2347_s0 + $0xa0] sm:$0xff]  ;;  %v31_v15 = vld [vmem:[%s2347_s0 + $0x28] sm:$0xff]  ;;  %v423_v17 = vld [vmem:[%s2348_s3 + $0x10] sm:$0xff] }
   0x6   :  { %1690 = vmatprep.mubr.msk.f32.mxu1 %vm67_vm0, %v42_v6  ;;  %v421_v13 = vld [vmem:[%s2348_s3] sm:$0xff]  ;;  %v424_v18 = vld [vmem:[%s2348_s3 + $0x18] sm:$0xff]  ;;  %v32_v19 = vld [vmem:[%s2347_s0 + $0x30] sm:$0xff] }
   0x7   :  { %v1846_v16 = vpack.c.bf16 %v422_v14, %v421_v13  ;;  %v47_v20 = vld [vmem:[%s2347_s0 + $0xa8] sm:$0xff]  ;;  %v1850_v21 = vpack.c.bf16 %v424_v18, %v423_v17  ;;  %v48_v22 = vld [vmem:[%s2347_s0 + $0xb0] sm:$0xff]  ;;  %v425_v23 = vld [vmem:[%s2348_s3 + $0x20] sm:$0xff] }
   0x8   :  { %1667 = vmatmul.mubr.msk.f32.vlgmr.msra.gmra.mrb[0].mxu0 %vm67_vm0, %v27_v4  ;;  %1691 = vmatmul.mubr.msk.f32.vlgmr.msra.gmra.mrb[0].mxu1 %vm67_vm0, %v43_v7  ;;  %v426_v24 = vld [vmem:[%s2348_s3 + $0x28] sm:$0xff]  ;;  %v33_v25 = vld [vmem:[%s2347_s0 + $0x38] sm:$0xff]  ;;  %v34_v26 = vld [vmem:[%s2347_s0 + $0x40] sm:$0xff] }
   0x9   :  { %1669 = vmatprep.mubr.msk.f32.mxu0 %vm67_vm0, %v28_v5  ;;  %1693 = vmatprep.mubr.msk.f32.mxu1 %vm67_vm0, %v44_v8  ;;  %v49_v27 = vld [vmem:[%s2347_s0 + $0xb8] sm:$0xff]  ;;  %v1854_v28 = vpack.c.bf16 %v426_v24, %v425_v23  ;;  %v50_v29 = vld [vmem:[%s2347_s0 + $0xc0] sm:$0xff]  ;;  %v427_v30 = vld [vmem:[%s2348_s3 + $0x30] sm:$0xff] }
   0xa   :  { %1847 = vmatprep.subr.bf16.mxu1 %v1846_v16  ;;  %v428_v31 = vld [vmem:[%s2348_s3 + $0x38] sm:$0xff]  ;;  %v35_v32 = vld [vmem:[%s2347_s0 + $0x48] sm:$0xff]  ;;  %v36_v33 = vld [vmem:[%s2347_s0 + $0x50] sm:$0xff] }
   0xb   :  { %1849 = vmatpush3.bf16.msra.mxu1 %v1846_v16  ;;  %v51_v34 = vld [vmem:[%s2347_s0 + $0xc8] sm:$0xff]  ;;  %v1858_v35 = vpack.c.bf16 %v428_v31, %v427_v30  ;;  %v52_v36 = vld [vmem:[%s2347_s0 + $0xd0] sm:$0xff]  ;;  %v37_v37 = vld [vmem:[%s2347_s0 + $0x58] sm:$0xff] }
   0xc   :  { %1670 = vmatmul.mubr.msk.f32.gmra.mrb[2].mxu0 %vm67_vm0, %v29_v9  ;;  %1694 = vmatmul.mubr.msk.f32.gmra.mrb[2].mxu1 %vm67_vm0, %v45_v11  ;;  %v38_v38 = vld [vmem:[%s2347_s0 + $0x60] sm:$0xff]  ;;  %v53_v39 = vld [vmem:[%s2347_s0 + $0xd8] sm:$0xff]  ;;  %v39_v41 = vld [vmem:[%s2347_s0 + $0x68] sm:$0xff] }
   0xd   :  { %1672 = vmatprep.mubr.msk.f32.mxu0 %vm67_vm0, %v30_v10  ;;  %1696 = vmatprep.mubr.msk.f32.mxu1 %vm67_vm0, %v46_v12  ;;  %v54_v40 = vld [vmem:[%s2347_s0 + $0xe0] sm:$0xff]  ;;  %v40_v42 = vld [vmem:[%s2347_s0 + $0x70] sm:$0xff]  ;;  %v55_v43 = vld [vmem:[%s2347_s0 + $0xe8] sm:$0xff] }
   0xe   :  { %1851 = vmatprep.subr.bf16.mxu1 %v1850_v21  ;;  %v56_v44 = vld [vmem:[%s2347_s0 + $0xf0] sm:$0xff]  ;;  %v41_v45 = vld [vmem:[%s2347_s0 + $0x78] sm:$0xff]  ;;  %v790_v47 = vld [vmem:[%s2349_s5] sm:$0xff] }
   0xf   :  { %1853 = vmatpush3.bf16.msra.mxu1 %v1850_v21  ;;  %v57_v46 = vld [vmem:[%s2347_s0 + $0xf8] sm:$0xff]  ;;  %v791_v48 = vld [vmem:[%s2349_s5 + $0x8] sm:$0xff]  ;;  %v792_v49 = vld [vmem:[%s2349_s5 + $0x10] sm:$0xff] }
  0x10   :  { %1673 = vmatmul.mubr.msk.f32.gmra.mrb[4].mxu0 %vm67_vm0, %v31_v15  ;;  %1697 = vmatmul.mubr.msk.f32.gmra.mrb[4].mxu1 %vm67_vm0, %v47_v20  ;;  %v1862_v50 = vpack.c.bf16 %v791_v48, %v790_v47  ;;  %v793_v51 = vld [vmem:[%s2349_s5 + $0x18] sm:$0xff]  ;;  %v794_v53 = vld [vmem:[%s2349_s5 + $0x20] sm:$0xff]  ;;  %v795_v54 = vld [vmem:[%s2349_s5 + $0x28] sm:$0xff] }
  0x11   :  { %1675 = vmatprep.mubr.msk.f32.mxu0 %vm67_vm0, %v32_v19  ;;  %1699 = vmatprep.mubr.msk.f32.mxu1 %vm67_vm0, %v48_v22  ;;  %v1866_v52 = vpack.c.bf16 %v793_v51, %v792_v49  ;;  %v1870_v55 = vpack.c.bf16 %v795_v54, %v794_v53  ;;  %v796_v56 = vld [vmem:[%s2349_s5 + $0x30] sm:$0xff]  ;;  %v797_v57 = vld [vmem:[%s2349_s5 + $0x38] sm:$0xff]  ;;  %v2105_v59 = vld [vmem:[%s2350_s2] ss:$0 sm:$0xff] }
  0x12   :  { %1855 = vmatprep.subr.bf16.mxu1 %v1854_v28  ;;  %1863 = vmatprep.subr.bf16.mxu0 %v1862_v50  ;;  %v1874_v58 = vpack.c.bf16 %v797_v57, %v796_v56 }
  0x13   :  { %1857 = vmatpush3.bf16.msra.mxu1 %v1854_v28  ;;  %1865 = vmatpush3.bf16.msra.mxu0 %v1862_v50 }
  0x14   :  { %1676 = vmatmul.mubr.msk.f32.gmra.mrb[6].mxu0 %vm67_vm0, %v33_v25  ;;  %1700 = vmatmul.mubr.msk.f32.gmra.mrb[6].mxu1 %vm67_vm0, %v49_v27 }
  0x15   :  { %1678 = vmatprep.mubr.msk.f32.mxu0 %vm67_vm0, %v34_v26  ;;  %1702 = vmatprep.mubr.msk.f32.mxu1 %vm67_vm0, %v50_v29 }
  0x16   :  { %1859 = vmatprep.subr.bf16.mxu1 %v1858_v35  ;;  %1867 = vmatprep.subr.bf16.mxu0 %v1866_v52 }
  0x17   :  { %1861 = vmatpush3.bf16.msra.mxu1 %v1858_v35  ;;  %1869 = vmatpush3.bf16.msra.mxu0 %v1866_v52 }
  0x18   :  { %1679 = vmatmul.mubr.msk.f32.gmra.mrb[8].mxu0 %vm67_vm0, %v35_v32  ;;  %1703 = vmatmul.mubr.msk.f32.gmra.mrb[8].mxu1 %vm67_vm0, %v51_v34 }
  0x19   :  { %1681 = vmatprep.mubr.msk.f32.mxu0 %vm67_vm0, %v36_v33  ;;  %1705 = vmatprep.mubr.msk.f32.mxu1 %vm67_vm0, %v52_v36 }
  0x1a   :  { %1871 = vmatprep.subr.bf16.mxu0 %v1870_v55 }
  0x1b   :  { %1873 = vmatpush3.bf16.msra.mxu0 %v1870_v55 }
  0x1c   :  { %1682 = vmatmul.mubr.msk.f32.gmra.mrb[10].mxu0 %vm67_vm0, %v37_v37  ;;  %1706 = vmatmul.mubr.msk.f32.gmra.mrb[10].mxu1 %vm67_vm0, %v53_v39 }
  0x1d   :  { %1684 = vmatprep.mubr.msk.f32.mxu0 %vm67_vm0, %v38_v38  ;;  %1708 = vmatprep.mubr.msk.f32.mxu1 %vm67_vm0, %v54_v40 }
  0x1e   :  { %1875 = vmatprep.subr.bf16.mxu0 %v1874_v58 }
  0x1f   :  { %1877 = vmatpush3.bf16.msra.mxu0 %v1874_v58 }
  0x20   :  { %1685 = vmatmul.mubr.msk.f32.gmra.mrb[12].mxu0 %vm67_vm0, %v39_v41  ;;  %1709 = vmatmul.mubr.msk.f32.gmra.mrb[12].mxu1 %vm67_vm0, %v55_v43 }
  0x21   :  { %1687 = vmatprep.mubr.msk.f32.mxu0 %vm67_vm0, %v40_v42  ;;  %1711 = vmatprep.mubr.msk.f32.mxu1 %vm67_vm0, %v56_v44 }
  0x24   :  { %1688 = vmatmul.mubr.msk.f32.gmra.mrb[14].mxu0 %vm67_vm0, %v41_v45  ;;  %1712 = vmatmul.mubr.msk.f32.gmra.mrb[14].mxu1 %vm67_vm0, %v57_v46 }
  0xdb   :  { %v1668_v60 = vpop.f32.mrb[0].mxu0  ;;  %v2108_v63 = vpop.f32.mrb[0].mxu1 }
  0xdc   :  { %v236_v61 = vadd.f32 %v1668_v60, %v2105_v59  ;;  %v230_v62 = vpop.f32.mrb[1].mxu0  ;;  %v2111_v1 = vpop.f32.mrb[1].mxu1 }
  0xdd   :  { %v231_v0 = vadd.f32 %v2105_v59, %v230_v62  ;;  %v311_v52 = vadd.f32 %v2105_v59, %v2111_v1  ;;  %v316_v1 = vadd.f32 %v2108_v63, %v2105_v59 }
  0xde   :  { %v390_v4 = vmax.f32 %v236_v61, 0.0 }
  0xdf   :  { %v389_v2 = vmax.f32 %v231_v0, 0.0  ;;  %v1671_v3 = vpop.f32.mrb[2].mxu0  ;;  %v2114_v7 = vpop.f32.mrb[2].mxu1  ;;  %v405_v61 = vmax.f32 %v311_v52, 0.0 }
  0xe0   :  { %v246_v5 = vadd.f32 %v1671_v3, %v2105_v59  ;;  %v240_v6 = vpop.f32.mrb[3].mxu0  ;;  %v2118_v9 = vpop.f32.mrb[3].mxu1 }
  0xe1   :  { %v241_v8 = vadd.f32 %v2105_v59, %v240_v6  ;;  %1730 = vmatprep.mubr.msk.f32.mxu1 %vm436_vm1, %v389_v2  ;;  %v321_v62 = vadd.f32 %v2105_v59, %v2118_v9 }
  0xe2   :  { %1731 = vmatmul.mubr.msk.f32.vlgmr.msra.gmra.mrb[16].mxu1 %vm436_vm1, %v390_v4  ;;  %v392_v12 = vmax.f32 %v246_v5, 0.0  ;;  %v406_v4 = vmax.f32 %v316_v1, 0.0  ;;  %v326_v5 = vadd.f32 %v2114_v7, %v2105_v59 }
  0xe3   :  { %v391_v10 = vmax.f32 %v241_v8, 0.0  ;;  %v1674_v11 = vpop.f32.mrb[4].mxu0  ;;  %v2122_v15 = vpop.f32.mrb[4].mxu1  ;;  %v407_v2 = vmax.f32 %v321_v62, 0.0 }
  0xe4   :  { %v256_v13 = vadd.f32 %v1674_v11, %v2105_v59  ;;  %v250_v14 = vpop.f32.mrb[5].mxu0  ;;  %v330_v17 = vpop.f32.mrb[5].mxu1  ;;  %v408_v8 = vmax.f32 %v326_v5, 0.0  ;;  %v336_v9 = vadd.f32 %v2122_v15, %v2105_v59 }
  0xe5   :  { %v251_v16 = vadd.f32 %v2105_v59, %v250_v14  ;;  %1733 = vmatprep.mubr.msk.f32.mxu1 %vm436_vm1, %v391_v10  ;;  %v331_v3 = vadd.f32 %v2105_v59, %v330_v17 }
  0xe6   :  { %1734 = vmatmul.mubr.msk.f32.gmra.mrb[18].mxu1 %vm436_vm1, %v392_v12  ;;  %v394_v20 = vmax.f32 %v256_v13, 0.0  ;;  %v410_v12 = vmax.f32 %v336_v9, 0.0 }
  0xe7   :  { %v393_v18 = vmax.f32 %v251_v16, 0.0  ;;  %v1677_v19 = vpop.f32.mrb[6].mxu0  ;;  %v2128_v23 = vpop.f32.mrb[6].mxu1  ;;  %v409_v6 = vmax.f32 %v331_v3, 0.0 }
  0xe8   :  { %v266_v21 = vadd.f32 %v1677_v19, %v2105_v59  ;;  %v260_v22 = vpop.f32.mrb[7].mxu0  ;;  %v340_v25 = vpop.f32.mrb[7].mxu1  ;;  %v346_v7 = vadd.f32 %v2128_v23, %v2105_v59 }
  0xe9   :  { %v261_v24 = vadd.f32 %v2105_v59, %v260_v22  ;;  %1736 = vmatprep.mubr.msk.f32.mxu1 %vm436_vm1, %v393_v18  ;;  %v341_v63 = vadd.f32 %v2105_v59, %v340_v25 }
  0xea   :  { %1737 = vmatmul.mubr.msk.f32.gmra.mrb[20].mxu1 %vm436_vm1, %v394_v20  ;;  %v396_v28 = vmax.f32 %v266_v21, 0.0  ;;  %v412_v16 = vmax.f32 %v346_v7, 0.0 }
  0xeb   :  { %v395_v26 = vmax.f32 %v261_v24, 0.0  ;;  %v1680_v27 = vpop.f32.mrb[8].mxu0  ;;  %v2134_v31 = vpop.f32.mrb[8].mxu1  ;;  %v411_v10 = vmax.f32 %v341_v63, 0.0 }
  0xec   :  { %v276_v29 = vadd.f32 %v1680_v27, %v2105_v59  ;;  %v270_v30 = vpop.f32.mrb[9].mxu0  ;;  %v350_v33 = vpop.f32.mrb[9].mxu1  ;;  %v356_v15 = vadd.f32 %v2134_v31, %v2105_v59 }
  0xed   :  { %v271_v32 = vadd.f32 %v2105_v59, %v270_v30  ;;  %1739 = vmatprep.mubr.msk.f32.mxu1 %vm436_vm1, %v395_v26  ;;  %v351_v11 = vadd.f32 %v2105_v59, %v350_v33 }
  0xee   :  { %1740 = vmatmul.mubr.msk.f32.gmra.mrb[22].mxu1 %vm436_vm1, %v396_v28  ;;  %v398_v36 = vmax.f32 %v276_v29, 0.0  ;;  %v414_v19 = vmax.f32 %v356_v15, 0.0  ;;  %v2195_v29 = vld [vmem:[%s2351_s4] ss:$0 sm:$0xff] }
  0xef   :  { %v397_v34 = vmax.f32 %v271_v32, 0.0  ;;  %v1683_v35 = vpop.f32.mrb[10].mxu0  ;;  %v1707_v39 = vpop.f32.mrb[10].mxu1  ;;  %v413_v13 = vmax.f32 %v351_v11, 0.0 }
  0xf0   :  { %v286_v37 = vadd.f32 %v1683_v35, %v2105_v59  ;;  %v280_v38 = vpop.f32.mrb[11].mxu0  ;;  %v360_v41 = vpop.f32.mrb[11].mxu1  ;;  %v366_v20 = vadd.f32 %v1707_v39, %v2105_v59 }
  0xf1   :  { %v281_v40 = vadd.f32 %v2105_v59, %v280_v38  ;;  %1742 = vmatprep.mubr.msk.f32.mxu1 %vm436_vm1, %v397_v34  ;;  %v361_v14 = vadd.f32 %v2105_v59, %v360_v41 }
  0xf2   :  { %1743 = vmatmul.mubr.msk.f32.gmra.mrb[24].mxu1 %vm436_vm1, %v398_v36  ;;  %v400_v44 = vmax.f32 %v286_v37, 0.0  ;;  %v416_v23 = vmax.f32 %v366_v20, 0.0 }
  0xf3   :  { %v399_v42 = vmax.f32 %v281_v40, 0.0  ;;  %v1686_v43 = vpop.f32.mrb[12].mxu0  ;;  %v1710_v47 = vpop.f32.mrb[12].mxu1  ;;  %v415_v17 = vmax.f32 %v361_v14, 0.0 }
  0xf4   :  { %v296_v45 = vadd.f32 %v1686_v43, %v2105_v59  ;;  %v290_v46 = vpop.f32.mrb[13].mxu0  ;;  %v370_v49 = vpop.f32.mrb[13].mxu1  ;;  %v376_v24 = vadd.f32 %v1710_v47, %v2105_v59 }
  0xf5   :  { %v291_v48 = vadd.f32 %v2105_v59, %v290_v46  ;;  %1745 = vmatprep.mubr.msk.f32.mxu1 %vm436_vm1, %v399_v42  ;;  %v371_v18 = vadd.f32 %v2105_v59, %v370_v49 }
  0xf6   :  { %1746 = vmatmul.mubr.msk.f32.gmra.mrb[26].mxu1 %vm436_vm1, %v400_v44  ;;  %v402_v53 = vmax.f32 %v296_v45, 0.0  ;;  %v418_v26 = vmax.f32 %v376_v24, 0.0 }
  0xf7   :  { %v401_v50 = vmax.f32 %v291_v48, 0.0  ;;  %v1689_v51 = vpop.f32.mrb[14].mxu0  ;;  %v1713_v56 = vpop.f32.mrb[14].mxu1  ;;  %v417_v21 = vmax.f32 %v371_v18, 0.0 }
  0xf8   :  { %v306_v54 = vadd.f32 %v1689_v51, %v2105_v59  ;;  %v300_v55 = vpop.f32.mrb[15].mxu0  ;;  %v380_v58 = vpop.f32.mrb[15].mxu1  ;;  %v386_v27 = vadd.f32 %v1713_v56, %v2105_v59 }
  0xf9   :  { %v301_v57 = vadd.f32 %v2105_v59, %v300_v55  ;;  %1748 = vmatprep.mubr.msk.f32.mxu1 %vm436_vm1, %v401_v50  ;;  %v381_v22 = vadd.f32 %v2105_v59, %v380_v58 }
  0xfa   :  { %1749 = vmatmul.mubr.msk.f32.gmra.mrb[28].mxu1 %vm436_vm1, %v402_v53  ;;  %v404_v0 = vmax.f32 %v306_v54, 0.0  ;;  %v420_v28 = vmax.f32 %v386_v27, 0.0 }
  0xfb   :  { %v403_v60 = vmax.f32 %v301_v57, 0.0  ;;  %v419_v25 = vmax.f32 %v381_v22, 0.0 }
  0xfd   :  { %1751 = vmatprep.mubr.msk.f32.mxu1 %vm436_vm1, %v403_v60 }
  0xfe   :  { %1752 = vmatmul.mubr.msk.f32.gmra.mrb[30].mxu1 %vm436_vm1, %v404_v0 }
  0xff   :  { %1754 = vmatprep.mubr.msk.f32.mxu1 %vm436_vm1, %v405_v61 }
 0x102   :  { %1755 = vmatmul.mubr.msk.f32.gmra.mrb[32].mxu1 %vm436_vm1, %v406_v4 }
 0x103   :  { %1757 = vmatprep.mubr.msk.f32.mxu1 %vm436_vm1, %v407_v2 }
 0x106   :  { %1758 = vmatmul.mubr.msk.f32.gmra.mrb[34].mxu1 %vm436_vm1, %v408_v8 }
 0x107   :  { %1760 = vmatprep.mubr.msk.f32.mxu1 %vm436_vm1, %v409_v6 }
 0x10a   :  { %1761 = vmatmul.mubr.msk.f32.gmra.mrb[36].mxu1 %vm436_vm1, %v410_v12 }
 0x10b   :  { %1763 = vmatprep.mubr.msk.f32.mxu1 %vm436_vm1, %v411_v10 }
 0x10e   :  { %1764 = vmatmul.mubr.msk.f32.gmra.mrb[38].mxu1 %vm436_vm1, %v412_v16 }
 0x10f   :  { %1766 = vmatprep.mubr.msk.f32.mxu1 %vm436_vm1, %v413_v13 }
 0x112   :  { %1767 = vmatmul.mubr.msk.f32.gmra.mrb[40].mxu1 %vm436_vm1, %v414_v19 }
 0x113   :  { %1769 = vmatprep.mubr.msk.f32.mxu1 %vm436_vm1, %v415_v17 }
 0x116   :  { %1770 = vmatmul.mubr.msk.f32.gmra.mrb[42].mxu1 %vm436_vm1, %v416_v23 }
 0x117   :  { %1772 = vmatprep.mubr.msk.f32.mxu1 %vm436_vm1, %v417_v21 }
 0x11a   :  { %1773 = vmatmul.mubr.msk.f32.gmra.mrb[44].mxu1 %vm436_vm1, %v418_v26 }
 0x11b   :  { %1775 = vmatprep.mubr.msk.f32.mxu1 %vm436_vm1, %v419_v25 }
 0x11e   :  { %1776 = vmatmul.mubr.msk.f32.gmra.mrb[46].mxu1 %vm436_vm1, %v420_v28 }
 0x1b5   :  { %v1732_v30 = vpop.f32.mrb[16].mxu1 }
 0x1b6   :  { %v605_v31 = vadd.f32 %v1732_v30, %v2195_v29  ;;  %v599_v32 = vpop.f32.mrb[17].mxu1 }
 0x1b7   :  { %v600_v33 = vadd.f32 %v2195_v29, %v599_v32 }
 0x1b8   :  { %v759_v35 = vmax.f32 %v605_v31, 0.0 }
 0x1b9   :  { %v758_v34 = vmax.f32 %v600_v33, 0.0  ;;  %v1735_v59 = vpop.f32.mrb[18].mxu1 }
 0x1ba   :  { %v615_v36 = vadd.f32 %v1735_v59, %v2195_v29  ;;  %v609_v37 = vpop.f32.mrb[19].mxu1 }
 0x1bb   :  { %v610_v38 = vadd.f32 %v2195_v29, %v609_v37  ;;  %1794 = vmatprep.mubr.msk.f32.mxu0 %vm436_vm1, %v758_v34 }
 0x1bc   :  { %1795 = vmatmul.mubr.msk.f32.vlgmr.msra.gmra.mrb[16].mxu0 %vm436_vm1, %v759_v35  ;;  %v761_v41 = vmax.f32 %v615_v36, 0.0 }
 0x1bd   :  { %v760_v39 = vmax.f32 %v610_v38, 0.0  ;;  %v1738_v40 = vpop.f32.mrb[20].mxu1 }
 0x1be   :  { %v625_v42 = vadd.f32 %v1738_v40, %v2195_v29  ;;  %v619_v43 = vpop.f32.mrb[21].mxu1 }
 0x1bf   :  { %v620_v44 = vadd.f32 %v2195_v29, %v619_v43  ;;  %1797 = vmatprep.mubr.msk.f32.mxu0 %vm436_vm1, %v760_v39 }
 0x1c0   :  { %1798 = vmatmul.mubr.msk.f32.gmra.mrb[18].mxu0 %vm436_vm1, %v761_v41  ;;  %v763_v47 = vmax.f32 %v625_v42, 0.0 }
 0x1c1   :  { %v762_v45 = vmax.f32 %v620_v44, 0.0  ;;  %v1741_v46 = vpop.f32.mrb[22].mxu1 }
 0x1c2   :  { %v635_v48 = vadd.f32 %v1741_v46, %v2195_v29  ;;  %v629_v49 = vpop.f32.mrb[23].mxu1 }
 0x1c3   :  { %v630_v50 = vadd.f32 %v2195_v29, %v629_v49  ;;  %1800 = vmatprep.mubr.msk.f32.mxu0 %vm436_vm1, %v762_v45 }
 0x1c4   :  { %1801 = vmatmul.mubr.msk.f32.gmra.mrb[20].mxu0 %vm436_vm1, %v763_v47  ;;  %v765_v53 = vmax.f32 %v635_v48, 0.0 }
 0x1c5   :  { %v764_v51 = vmax.f32 %v630_v50, 0.0  ;;  %v1744_v52 = vpop.f32.mrb[24].mxu1 }
 0x1c6   :  { %v645_v54 = vadd.f32 %v1744_v52, %v2195_v29  ;;  %v639_v55 = vpop.f32.mrb[25].mxu1 }
 0x1c7   :  { %v640_v56 = vadd.f32 %v2195_v29, %v639_v55  ;;  %1803 = vmatprep.mubr.msk.f32.mxu0 %vm436_vm1, %v764_v51 }
 0x1c8   :  { %1804 = vmatmul.mubr.msk.f32.gmra.mrb[22].mxu0 %vm436_vm1, %v765_v53  ;;  %v767_v60 = vmax.f32 %v645_v54, 0.0 }
 0x1c9   :  { %v766_v57 = vmax.f32 %v640_v56, 0.0  ;;  %v1747_v58 = vpop.f32.mrb[26].mxu1 }
 0x1ca   :  { %v655_v61 = vadd.f32 %v1747_v58, %v2195_v29  ;;  %v649_v62 = vpop.f32.mrb[27].mxu1 }
 0x1cb   :  { %v650_v0 = vadd.f32 %v2195_v29, %v649_v62  ;;  %1806 = vmatprep.mubr.msk.f32.mxu0 %vm436_vm1, %v766_v57 }
 0x1cc   :  { %1807 = vmatmul.mubr.msk.f32.gmra.mrb[24].mxu0 %vm436_vm1, %v767_v60  ;;  %v769_v3 = vmax.f32 %v655_v61, 0.0 }
 0x1cd   :  { %v768_v1 = vmax.f32 %v650_v0, 0.0  ;;  %v1750_v2 = vpop.f32.mrb[28].mxu1  ;;  %v2264_v0 = vld [vmem:[%s2352_s6] ss:$0 sm:$0xff] }
 0x1ce   :  { %v665_v4 = vadd.f32 %v1750_v2, %v2195_v29  ;;  %v659_v5 = vpop.f32.mrb[29].mxu1 }
 0x1cf   :  { %v660_v6 = vadd.f32 %v2195_v29, %v659_v5  ;;  %1809 = vmatprep.mubr.msk.f32.mxu0 %vm436_vm1, %v768_v1 }
 0x1d0   :  { %1810 = vmatmul.mubr.msk.f32.gmra.mrb[26].mxu0 %vm436_vm1, %v769_v3  ;;  %v771_v9 = vmax.f32 %v665_v4, 0.0 }
 0x1d1   :  { %v770_v63 = vmax.f32 %v660_v6, 0.0  ;;  %v1753_v8 = vpop.f32.mrb[30].mxu1 }
 0x1d2   :  { %v675_v10 = vadd.f32 %v1753_v8, %v2195_v29  ;;  %v669_v11 = vpop.f32.mrb[31].mxu1 }
 0x1d3   :  { %v670_v12 = vadd.f32 %v2195_v29, %v669_v11  ;;  %1812 = vmatprep.mubr.msk.f32.mxu0 %vm436_vm1, %v770_v63 }
 0x1d4   :  { %1813 = vmatmul.mubr.msk.f32.gmra.mrb[28].mxu0 %vm436_vm1, %v771_v9  ;;  %v773_v14 = vmax.f32 %v675_v10, 0.0 }
 0x1d5   :  { %v772_v7 = vmax.f32 %v670_v12, 0.0  ;;  %v1756_v13 = vpop.f32.mrb[32].mxu1 }
 0x1d6   :  { %v685_v16 = vadd.f32 %v1756_v13, %v2195_v29  ;;  %v679_v15 = vpop.f32.mrb[33].mxu1 }
 0x1d7   :  { %v680_v17 = vadd.f32 %v2195_v29, %v679_v15  ;;  %1815 = vmatprep.mubr.msk.f32.mxu0 %vm436_vm1, %v772_v7 }
 0x1d8   :  { %1816 = vmatmul.mubr.msk.f32.gmra.mrb[30].mxu0 %vm436_vm1, %v773_v14  ;;  %v775_v20 = vmax.f32 %v685_v16, 0.0 }
 0x1d9   :  { %v774_v18 = vmax.f32 %v680_v17, 0.0  ;;  %v1759_v19 = vpop.f32.mrb[34].mxu1 }
 0x1da   :  { %v695_v21 = vadd.f32 %v1759_v19, %v2195_v29  ;;  %v689_v22 = vpop.f32.mrb[35].mxu1 }
 0x1db   :  { %v690_v23 = vadd.f32 %v2195_v29, %v689_v22  ;;  %1818 = vmatprep.mubr.msk.f32.mxu0 %vm436_vm1, %v774_v18 }
 0x1dc   :  { %1819 = vmatmul.mubr.msk.f32.gmra.mrb[32].mxu0 %vm436_vm1, %v775_v20  ;;  %v777_v26 = vmax.f32 %v695_v21, 0.0 }
 0x1dd   :  { %v776_v24 = vmax.f32 %v690_v23, 0.0  ;;  %v1762_v25 = vpop.f32.mrb[36].mxu1 }
 0x1de   :  { %v705_v27 = vadd.f32 %v1762_v25, %v2195_v29  ;;  %v699_v28 = vpop.f32.mrb[37].mxu1 }
 0x1df   :  { %v700_v30 = vadd.f32 %v2195_v29, %v699_v28  ;;  %1821 = vmatprep.mubr.msk.f32.mxu0 %vm436_vm1, %v776_v24 }
 0x1e0   :  { %1822 = vmatmul.mubr.msk.f32.gmra.mrb[34].mxu0 %vm436_vm1, %v777_v26  ;;  %v779_v33 = vmax.f32 %v705_v27, 0.0 }
 0x1e1   :  { %v778_v31 = vmax.f32 %v700_v30, 0.0  ;;  %v1765_v32 = vpop.f32.mrb[38].mxu1 }
 0x1e2   :  { %v715_v34 = vadd.f32 %v1765_v32, %v2195_v29  ;;  %v709_v59 = vpop.f32.mrb[39].mxu1 }
 0x1e3   :  { %v710_v35 = vadd.f32 %v2195_v29, %v709_v59  ;;  %1824 = vmatprep.mubr.msk.f32.mxu0 %vm436_vm1, %v778_v31 }
 0x1e4   :  { %1825 = vmatmul.mubr.msk.f32.gmra.mrb[36].mxu0 %vm436_vm1, %v779_v33  ;;  %v781_v38 = vmax.f32 %v715_v34, 0.0 }
 0x1e5   :  { %v780_v36 = vmax.f32 %v710_v35, 0.0  ;;  %v1768_v37 = vpop.f32.mrb[40].mxu1 }
 0x1e6   :  { %v725_v39 = vadd.f32 %v1768_v37, %v2195_v29  ;;  %v719_v40 = vpop.f32.mrb[41].mxu1 }
 0x1e7   :  { %v720_v41 = vadd.f32 %v2195_v29, %v719_v40  ;;  %1827 = vmatprep.mubr.msk.f32.mxu0 %vm436_vm1, %v780_v36 }
 0x1e8   :  { %1828 = vmatmul.mubr.msk.f32.gmra.mrb[38].mxu0 %vm436_vm1, %v781_v38  ;;  %v783_v44 = vmax.f32 %v725_v39, 0.0 }
 0x1e9   :  { %v782_v42 = vmax.f32 %v720_v41, 0.0  ;;  %v1771_v43 = vpop.f32.mrb[42].mxu1 }
 0x1ea   :  { %v735_v45 = vadd.f32 %v1771_v43, %v2195_v29  ;;  %v729_v46 = vpop.f32.mrb[43].mxu1 }
 0x1eb   :  { %v730_v47 = vadd.f32 %v2195_v29, %v729_v46  ;;  %1830 = vmatprep.mubr.msk.f32.mxu0 %vm436_vm1, %v782_v42 }
 0x1ec   :  { %1831 = vmatmul.mubr.msk.f32.gmra.mrb[40].mxu0 %vm436_vm1, %v783_v44  ;;  %v785_v50 = vmax.f32 %v735_v45, 0.0 }
 0x1ed   :  { %v784_v48 = vmax.f32 %v730_v47, 0.0  ;;  %v1774_v49 = vpop.f32.mrb[44].mxu1 }
 0x1ee   :  { %v745_v51 = vadd.f32 %v1774_v49, %v2195_v29  ;;  %v739_v52 = vpop.f32.mrb[45].mxu1 }
 0x1ef   :  { %v740_v53 = vadd.f32 %v2195_v29, %v739_v52  ;;  %1833 = vmatprep.mubr.msk.f32.mxu0 %vm436_vm1, %v784_v48 }
 0x1f0   :  { %1834 = vmatmul.mubr.msk.f32.gmra.mrb[42].mxu0 %vm436_vm1, %v785_v50  ;;  %v787_v56 = vmax.f32 %v745_v51, 0.0 }
 0x1f1   :  { %v786_v54 = vmax.f32 %v740_v53, 0.0  ;;  %v1777_v55 = vpop.f32.mrb[46].mxu1 }
 0x1f2   :  { %v755_v57 = vadd.f32 %v1777_v55, %v2195_v29  ;;  %v749_v58 = vpop.f32.mrb[47].mxu1 }
 0x1f3   :  { %v750_v60 = vadd.f32 %v2195_v29, %v749_v58  ;;  %1836 = vmatprep.mubr.msk.f32.mxu0 %vm436_vm1, %v786_v54 }
 0x1f4   :  { %1837 = vmatmul.mubr.msk.f32.gmra.mrb[44].mxu0 %vm436_vm1, %v787_v56  ;;  %v789_v62 = vmax.f32 %v755_v57, 0.0 }
 0x1f5   :  { %v788_v61 = vmax.f32 %v750_v60, 0.0 }
 0x1f7   :  { %1839 = vmatprep.mubr.msk.f32.mxu0 %vm436_vm1, %v788_v61 }
 0x1f8   :  { %1840 = vmatmul.mubr.msk.f32.gmra.mrb[46].mxu0 %vm436_vm1, %v789_v62 }
 0x28f   :  { %v1796_v1 = vpop.f32.mrb[16].mxu0 }
 0x290   :  { %v973_v2 = vadd.f32 %v1796_v1, %v2264_v0  ;;  %v967_v3 = vpop.f32.mrb[17].mxu0 }
 0x291   :  { %v968_v29 = vadd.f32 %v2264_v0, %v967_v3 }
 0x293   :  { %v1456_v4 = vpack.c.bf16 %v973_v2, %v968_v29  ;;  %v1799_v5 = vpop.f32.mrb[18].mxu0 }
 0x294   :  { %v983_v6 = vadd.f32 %v1799_v5, %v2264_v0  ;;  %v977_v63 = vpop.f32.mrb[19].mxu0 }
 0x295   :  { %1457 = vst [vmem:[%s2353_s7] sm:$0xff] %v1456_v4   ;;  %v978_v8 = vadd.f32 %v2264_v0, %v977_v63 }
 0x297   :  { %v1461_v9 = vpack.c.bf16 %v983_v6, %v978_v8  ;;  %v1802_v10 = vpop.f32.mrb[20].mxu0 }
 0x298   :  { %v993_v11 = vadd.f32 %v1802_v10, %v2264_v0  ;;  %v987_v12 = vpop.f32.mrb[21].mxu0 }
 0x299   :  { %1533 = vst [vmem:[%s2353_s7 + $0x8] sm:$0xff] %v1461_v9   ;;  %v988_v7 = vadd.f32 %v2264_v0, %v987_v12 }
 0x29b   :  { %v1466_v13 = vpack.c.bf16 %v993_v11, %v988_v7  ;;  %v1805_v14 = vpop.f32.mrb[22].mxu0 }
 0x29c   :  { %v1003_v16 = vadd.f32 %v1805_v14, %v2264_v0  ;;  %v997_v15 = vpop.f32.mrb[23].mxu0 }
 0x29d   :  { %1534 = vst [vmem:[%s2353_s7 + $0x10] sm:$0xff] %v1466_v13   ;;  %v998_v17 = vadd.f32 %v2264_v0, %v997_v15 }
 0x29f   :  { %v1471_v18 = vpack.c.bf16 %v1003_v16, %v998_v17  ;;  %v1808_v19 = vpop.f32.mrb[24].mxu0 }
 0x2a0   :  { %v1013_v20 = vadd.f32 %v1808_v19, %v2264_v0  ;;  %v1007_v21 = vpop.f32.mrb[25].mxu0 }
 0x2a1   :  { %1535 = vst [vmem:[%s2353_s7 + $0x18] sm:$0xff] %v1471_v18   ;;  %v1008_v22 = vadd.f32 %v2264_v0, %v1007_v21 }
 0x2a3   :  { %v1476_v23 = vpack.c.bf16 %v1013_v20, %v1008_v22  ;;  %v1811_v24 = vpop.f32.mrb[26].mxu0 }
 0x2a4   :  { %v1023_v25 = vadd.f32 %v1811_v24, %v2264_v0  ;;  %v1017_v26 = vpop.f32.mrb[27].mxu0 }
 0x2a5   :  { %1536 = vst [vmem:[%s2353_s7 + $0x20] sm:$0xff] %v1476_v23   ;;  %v1018_v27 = vadd.f32 %v2264_v0, %v1017_v26 }
 0x2a7   :  { %v1481_v28 = vpack.c.bf16 %v1023_v25, %v1018_v27  ;;  %v1814_v30 = vpop.f32.mrb[28].mxu0 }
 0x2a8   :  { %v1033_v31 = vadd.f32 %v1814_v30, %v2264_v0  ;;  %v1027_v32 = vpop.f32.mrb[29].mxu0 }
 0x2a9   :  { %1537 = vst [vmem:[%s2353_s7 + $0x28] sm:$0xff] %v1481_v28   ;;  %v1028_v33 = vadd.f32 %v2264_v0, %v1027_v32 }
 0x2ab   :  { %v1486_v34 = vpack.c.bf16 %v1033_v31, %v1028_v33  ;;  %v1817_v59 = vpop.f32.mrb[30].mxu0 }
 0x2ac   :  { %v1043_v35 = vadd.f32 %v1817_v59, %v2264_v0  ;;  %v1037_v36 = vpop.f32.mrb[31].mxu0 }
 0x2ad   :  { %1538 = vst [vmem:[%s2353_s7 + $0x30] sm:$0xff] %v1486_v34   ;;  %v1038_v37 = vadd.f32 %v2264_v0, %v1037_v36 }
 0x2af   :  { %v1491_v38 = vpack.c.bf16 %v1043_v35, %v1038_v37  ;;  %v1820_v39 = vpop.f32.mrb[32].mxu0 }
 0x2b0   :  { %v1053_v40 = vadd.f32 %v1820_v39, %v2264_v0  ;;  %v1047_v41 = vpop.f32.mrb[33].mxu0 }
 0x2b1   :  { %1539 = vst [vmem:[%s2353_s7 + $0x38] sm:$0xff] %v1491_v38   ;;  %v1048_v42 = vadd.f32 %v2264_v0, %v1047_v41 }
 0x2b3   :  { %v1496_v43 = vpack.c.bf16 %v1053_v40, %v1048_v42  ;;  %v1823_v44 = vpop.f32.mrb[34].mxu0 }
 0x2b4   :  { %v1063_v45 = vadd.f32 %v1823_v44, %v2264_v0  ;;  %v1057_v46 = vpop.f32.mrb[35].mxu0 }
 0x2b5   :  { %1540 = vst [vmem:[%s2353_s7 + $0x40] sm:$0xff] %v1496_v43   ;;  %v1058_v47 = vadd.f32 %v2264_v0, %v1057_v46 }
 0x2b7   :  { %v1501_v48 = vpack.c.bf16 %v1063_v45, %v1058_v47  ;;  %v1826_v49 = vpop.f32.mrb[36].mxu0 }
 0x2b8   :  { %v1073_v50 = vadd.f32 %v1826_v49, %v2264_v0  ;;  %v1067_v51 = vpop.f32.mrb[37].mxu0 }
 0x2b9   :  { %1541 = vst [vmem:[%s2353_s7 + $0x48] sm:$0xff] %v1501_v48   ;;  %v1068_v52 = vadd.f32 %v2264_v0, %v1067_v51 }
 0x2bb   :  { %v1506_v53 = vpack.c.bf16 %v1073_v50, %v1068_v52  ;;  %v1829_v54 = vpop.f32.mrb[38].mxu0 }
 0x2bc   :  { %v1083_v55 = vadd.f32 %v1829_v54, %v2264_v0  ;;  %v1077_v56 = vpop.f32.mrb[39].mxu0 }
 0x2bd   :  { %1542 = vst [vmem:[%s2353_s7 + $0x50] sm:$0xff] %v1506_v53   ;;  %v1078_v57 = vadd.f32 %v2264_v0, %v1077_v56 }
 0x2bf   :  { %v1511_v58 = vpack.c.bf16 %v1083_v55, %v1078_v57  ;;  %v1832_v60 = vpop.f32.mrb[40].mxu0 }
 0x2c0   :  { %v1093_v61 = vadd.f32 %v1832_v60, %v2264_v0  ;;  %v1087_v62 = vpop.f32.mrb[41].mxu0 }
 0x2c1   :  { %1543 = vst [vmem:[%s2353_s7 + $0x58] sm:$0xff] %v1511_v58   ;;  %v1088_v1 = vadd.f32 %v2264_v0, %v1087_v62 }
 0x2c3   :  { %v1516_v2 = vpack.c.bf16 %v1093_v61, %v1088_v1  ;;  %v1835_v3 = vpop.f32.mrb[42].mxu0 }
 0x2c4   :  { %v1103_v29 = vadd.f32 %v1835_v3, %v2264_v0  ;;  %v1097_v4 = vpop.f32.mrb[43].mxu0 }
 0x2c5   :  { %1544 = vst [vmem:[%s2353_s7 + $0x60] sm:$0xff] %v1516_v2   ;;  %v1098_v5 = vadd.f32 %v2264_v0, %v1097_v4 }
 0x2c7   :  { %v1521_v6 = vpack.c.bf16 %v1103_v29, %v1098_v5  ;;  %v1838_v63 = vpop.f32.mrb[44].mxu0 }
 0x2c8   :  { %v1113_v8 = vadd.f32 %v1838_v63, %v2264_v0  ;;  %v1107_v9 = vpop.f32.mrb[45].mxu0 }
 0x2c9   :  { %1545 = vst [vmem:[%s2353_s7 + $0x68] sm:$0xff] %v1521_v6   ;;  %v1108_v10 = vadd.f32 %v2264_v0, %v1107_v9 }
 0x2cb   :  { %v1526_v11 = vpack.c.bf16 %v1113_v8, %v1108_v10  ;;  %v1841_v12 = vpop.f32.mrb[46].mxu0 }
 0x2cc   :  { %v1123_v7 = vadd.f32 %v1841_v12, %v2264_v0  ;;  %v1117_v13 = vpop.f32.mrb[47].mxu0 }
 0x2cd   :  { %1546 = vst [vmem:[%s2353_s7 + $0x70] sm:$0xff] %v1526_v11   ;;  %v1118_v14 = vadd.f32 %v2264_v0, %v1117_v13 }
 0x2cf   :  { %v1531_v16 = vpack.c.bf16 %v1123_v7, %v1118_v14 }
 0x2d1   :  { %1547 = vst [vmem:[%s2353_s7 + $0x78] sm:$0xff] %v1531_v16  }

</bundles_post_ra>
